<compile_context>
chip_gen: v5e
topology: v5e:2x2
jax: 0.10.0
libtpu: 0.0.40
codegen_flags: <defaults>
</compile_context>

<pallas_src>
import functools
from typing import NamedTuple

import jax
import jax.numpy as jnp
from jax import lax
from jax.experimental import pallas as pl
from jax.experimental.pallas import tpu as pltpu


def _round_up(x: int, m: int) -> int:
    return ((x + m - 1) // m) * m


def _cdiv(a: int, b: int) -> int:
    return -(-a // b)


# Conservative across v5e/v6e (128 MiB physical VMEM) and v7x (64 MiB per TC).
_VMEM_BUDGET = 28 * 1024 * 1024
_VMEM_LIMIT = 32 * 1024 * 1024


class _HeadPlan(NamedTuple):
    resident: bool   # weight fully VMEM-resident; K grid axis dropped
    tm: int
    tn: int
    tk: int
    kp: int          # padded in_features  (weight rows)
    np: int          # padded out_features (weight cols, lane-dense output)


def _plan_head(in_features, out_features, w_itemsize, *, x_itemsize=4,
               tm=256, tn=1024, tk=2048, force_tiled=False,
               budget_bytes=_VMEM_BUDGET):
    """One-time (init) tiling plan. All padding of parameters uses this plan."""
    kp0 = _round_up(in_features, 128)
    np0 = _round_up(out_features, 128)

    # ---- weight-resident path: whole (Kp, Np) weight lives in VMEM ---------
    tm_res = min(tm, 512)
    resident_bytes = (
        2 * tm_res * kp0 * x_itemsize   # streamed x tile, double-buffered
        + 2 * kp0 * np0 * w_itemsize    # weight (count 2x conservatively)
        + 2 * np0 * 4                   # f32 bias
        + 2 * tm_res * np0 * 4          # f32 output tile
    )
    if not force_tiled and resident_bytes <= budget_bytes:
        return _HeadPlan(True, tm_res, np0, kp0, kp0, np0)

    # ---- streamed/tiled (M, N, K) path --------------------------------------
    tn_ = min(tn, np0)
    tk_ = min(tk, kp0)
    tm_ = tm

    def tiled_bytes(tm__, tk__, tn__):
        return (2 * tm__ * tk__ * x_itemsize + 2 * tk__ * tn__ * w_itemsize
                + 2 * tn__ * 4 + 2 * tm__ * tn__ * 4)

    # Shrink tiles (keeping (8, 128) alignment) until under the VMEM budget.
    while (tiled_bytes(tm_, tk_, tn_) > budget_bytes
           and tk_ >= 512 and (tk_ // 2) % 128 == 0):
        tk_ //= 2
    while (tiled_bytes(tm_, tk_, tn_) > budget_bytes
           and tn_ >= 256 and (tn_ // 2) % 128 == 0):
        tn_ //= 2
    while tiled_bytes(tm_, tk_, tn_) > budget_bytes and tm_ > 64:
        tm_ //= 2

    kp = _round_up(in_features, tk_)
    np_ = _round_up(out_features, tn_)
    return _HeadPlan(False, tm_, tn_, tk_, kp, np_)


def _dot_precision(dtype):
    # Exact f32 semantics when parameters are f32; native bf16 MXU rate otherwise.
    return lax.Precision.HIGHEST if dtype == jnp.float32 else None


def _head_resident_kernel(x_ref, wt_ref, b_ref, o_ref):
    """Weight resident in VMEM; 1-D grid over M tiles only."""
    x = x_ref[...].astype(wt_ref.dtype)
    o_ref[...] = (
        jnp.dot(x, wt_ref[...], preferred_element_type=jnp.float32,
                precision=_dot_precision(wt_ref.dtype))
        + b_ref[...]
    ).astype(o_ref.dtype)


def _head_tiled_kernel(x_ref, wt_ref, b_ref, o_ref):
    """(M, N, K) grid; K is the last (reduction) axis. The f32 output block is
    resident across K, so it doubles as the accumulator (no scratch needed);
    the bias initializes it at k == 0."""
    k = pl.program_id(2)

    @pl.when(k == 0)
    def _():
        o_ref[...] = jnp.broadcast_to(b_ref[...], o_ref.shape).astype(o_ref.dtype)

    x = x_ref[...].astype(wt_ref.dtype)
    o_ref[...] += jnp.dot(x, wt_ref[...], preferred_element_type=jnp.float32,
                          precision=_dot_precision(wt_ref.dtype))


@functools.partial(
    jax.jit,
    static_argnames=("out_features", "resident", "tm", "tn", "tk"),
)
def _head_forward(x, w_pad, b_pad, *, out_features, resident, tm, tn, tk):
    """x: (B, IN); w_pad: (Kp, Np) pre-transposed + pre-padded; b_pad: (1, Np)."""
    B, IN = x.shape
    Kp, Np = w_pad.shape

    TM = min(tm, _round_up(B, 8))
    # v7x has 2 TensorCores: make sure at least one "parallel" axis has >= 2
    # tiles when the batch allows it (no-op on v5e/v6e).
    n_par = 1 if resident else _cdiv(Np, min(tn, Np))
    if B >= 16 and n_par < 2 and _cdiv(B, TM) < 2:
        TM = _round_up(_cdiv(B, 2), 8)
    Mp = _round_up(B, TM)

    xp = x
    if Mp != B or Kp != IN:
        # Only the (small, per-call) activation is padded in the hot path.
        xp = jnp.pad(x, ((0, Mp - B), (0, Kp - IN)))

    x_isz = xp.dtype.itemsize
    w_isz = w_pad.dtype.itemsize

    if resident:
        grid = (Mp // TM,)
        in_specs = [
            pl.BlockSpec((TM, Kp), lambda i: (i, 0)),
            pl.BlockSpec((Kp, Np), lambda i: (0, 0)),   # fetched once, stays put
            pl.BlockSpec((1, Np), lambda i: (0, 0)),
        ]
        out_specs = pl.BlockSpec((TM, Np), lambda i: (i, 0))
        kernel = _head_resident_kernel
        dim_sem = ("parallel",)
        w_reads = 1
    else:
        TN = min(tn, Np)
        TK = min(tk, Kp)
        grid = (Mp // TM, Np // TN, Kp // TK)
        in_specs = [
            pl.BlockSpec((TM, TK), lambda i, j, k: (i, k)),
            pl.BlockSpec((TK, TN), lambda i, j, k: (k, j)),
            pl.BlockSpec((1, TN), lambda i, j, k: (0, j)),
        ]
        out_specs = pl.BlockSpec((TM, TN), lambda i, j, k: (i, j))
        kernel = _head_tiled_kernel
        dim_sem = ("parallel", "parallel", "arbitrary")
        w_reads = Mp // TM  # weight re-streamed once per M tile

    cost = pl.CostEstimate(
        flops=2 * Mp * Kp * Np,
        transcendentals=0,
        bytes_accessed=(Mp * Kp * x_isz + w_reads * Kp * Np * w_isz
                        + Np * 4 + Mp * Np * 4),
    )

    out = pl.pallas_call(
        kernel,
        out_shape=jax.ShapeDtypeStruct((Mp, Np), jnp.float32),
        grid_spec=pltpu.PrefetchScalarGridSpec(
            num_scalar_prefetch=0,
            grid=grid,
            in_specs=in_specs,
            out_specs=out_specs,
        ),
        compiler_params=pltpu.CompilerParams(
            dimension_semantics=dim_sem,
            vmem_limit_bytes=_VMEM_LIMIT,
        ),
        cost_estimate=cost,
    )(xp, w_pad, b_pad)

    return out[:B, :out_features]


class HeadPallas:
    """Mirrors the PyTorch Head module: forward(observation)[obs_key] -> Linear."""

    def __init__(self, observation_key, in_features, out_features, key, *,
                 param_dtype=jnp.bfloat16, plan_kwargs=None):
        self.observation_key = observation_key
        self.in_features = in_features
        self.out_features = out_features

        # nn.Linear-style init; f32 master copies kept for reference checks.
        kw, kb = jax.random.split(key)
        bound = 1.0 / float(in_features) ** 0.5
        self.weight = jax.random.uniform(
            kw, (out_features, in_features), jnp.float32, -bound, bound)
        self.bias = jax.random.uniform(
            kb, (out_features,), jnp.float32, -bound, bound)

        # One-time plan + parameter layout: transpose, cast, pad — never again
        # on the hot path.
        plan = _plan_head(in_features, out_features,
                          jnp.dtype(param_dtype).itemsize,
                          **(plan_kwargs or {}))
        self._plan = plan
        Kp, Np = plan.kp, plan.np

        wt = self.weight.T.astype(param_dtype)               # (IN, OUT), cast once
        self.weight_t = jnp.pad(
            wt, ((0, Kp - in_features), (0, Np - out_features)))
        self.bias_p = jnp.pad(
            self.bias, (0, Np - out_features)).reshape(1, Np)  # kept f32

    def __call__(self, observation):
        x = observation[self.observation_key]
        lead = x.shape[:-1]
        x2d = x.reshape((-1, self.in_features))
        y = _head_forward(
            x2d, self.weight_t, self.bias_p,
            out_features=self.out_features,
            resident=self._plan.resident,
            tm=self._plan.tm, tn=self._plan.tn, tk=self._plan.tk,
        )
        return y.reshape((*lead, self.out_features))


if __name__ == "__main__":
    key = jax.random.PRNGKey(0)
    k0, k1, k2, kx0, kx1, kx2 = jax.random.split(key, 6)

    def ref_linear(x, head):
        return (jnp.dot(x, head.weight.T, precision=lax.Precision.HIGHEST)
                + head.bias)

    # 1) Tiny demo shape, default bf16 parameters (VMEM-resident weight path).
    batch, in_f, out_f = 8, 32, 16
    head_bf16 = HeadPallas("obs", in_f, out_f, k0)
    x = jax.random.normal(kx0, (batch, in_f), jnp.float32)
    y = head_bf16({"obs": x})
    jax.block_until_ready(y)
    assert y.shape == (batch, out_f)
    assert jnp.allclose(y, ref_linear(x, head_bf16), atol=5e-2, rtol=5e-2)

    # 2) Exact-f32 parameters, non-128-aligned dims, multi-M-tile resident grid.
    head_f32 = HeadPallas("obs", 200, 300, k1, param_dtype=jnp.float32)
    x2 = jax.random.normal(kx1, (40, 200), jnp.float32)
    y2 = head_f32({"obs": x2})
    jax.block_until_ready(y2)
    assert y2.shape == (40, 300)
    assert jnp.allclose(y2, ref_linear(x2, head_f32), atol=1e-4, rtol=1e-4)

    # 3) Force the streamed/tiled (M, N, K) path to exercise the K-reduction grid.
    head_tiled = HeadPallas(
        "obs", 512, 256, k2, param_dtype=jnp.float32,
        plan_kwargs=dict(force_tiled=True, tm=8, tn=128, tk=256))
    x3 = jax.random.normal(kx2, (16, 512), jnp.float32)
    y3 = head_tiled({"obs": x3})
    jax.block_until_ready(y3)
    assert y3.shape == (16, 256)
    assert jnp.allclose(y3, ref_linear(x3, head_tiled), atol=1e-4, rtol=1e-4)

    print("KERNEL_OK")
</pallas_src>

<mosaic_0001>
module attributes {stable_mosaic.version = 11 : i64} {
  func.func @_head_resident_kernel(%arg0: i32, %arg1: memref<8x128xf32, #tpu.memory_space<vmem>>, %arg2: memref<128x128xbf16, #tpu.memory_space<vmem>>, %arg3: memref<1x128xf32, #tpu.memory_space<vmem>>, %arg4: memref<8x128xf32, #tpu.memory_space<vmem>>) attributes {dimension_semantics = [#tpu.dimension_semantics<parallel>], iteration_bounds = array<i64: 1>, scalar_prefetch = 0 : i64, scratch_operands = 0 : i64, tpu.core_type = #tpu.core_type<tc>, window_params = [{transform_indices = @transform_0, window_bounds = array<i64: 8, 128>}, {pipeline_mode = #tpu.pipeline_mode<synchronous>, transform_indices = @transform_1, window_bounds = array<i64: 128, 128>}, {pipeline_mode = #tpu.pipeline_mode<synchronous>, transform_indices = @transform_2, window_bounds = array<i64: 1, 128>}, {transform_indices = @transform_3, window_bounds = array<i64: 8, 128>}]} {
    %c0 = arith.constant 0 : index
    %c0_0 = arith.constant 0 : index
    %0 = vector.load %arg1[%c0, %c0_0] : memref<8x128xf32, #tpu.memory_space<vmem>>, vector<8x128xf32>
    %1 = arith.truncf %0 : vector<8x128xf32> to vector<8x128xbf16>
    %c0_1 = arith.constant 0 : index
    %c0_2 = arith.constant 0 : index
    %2 = vector.load %arg2[%c0_1, %c0_2] : memref<128x128xbf16, #tpu.memory_space<vmem>>, vector<128x128xbf16>
    %cst = arith.constant dense<0.000000e+00> : vector<8x128xf32>
    %3 = tpu.matmul %1, %2, %cst {dimension_numbers = #tpu.dot_dimension_numbers<[1], [0], [0], [1], [0, 0, 1, 1], [], []>} : vector<8x128xbf16>, vector<128x128xbf16>, vector<8x128xf32> -> vector<8x128xf32>
    %c0_3 = arith.constant 0 : index
    %c0_4 = arith.constant 0 : index
    %4 = vector.load %arg3[%c0_3, %c0_4] : memref<1x128xf32, #tpu.memory_space<vmem>>, vector<1x128xf32>
    %5 = vector.broadcast %4 : vector<1x128xf32> to vector<8x128xf32>
    %6 = arith.addf %3, %5 : vector<8x128xf32>
    %c0_5 = arith.constant 0 : index
    %c0_6 = arith.constant 0 : index
    %7 = vector.load %arg4[%c0_5, %c0_6] : memref<8x128xf32, #tpu.memory_space<vmem>>, vector<8x128xf32>
    tpu.vector_store %arg4[%c0_5, %c0_6], %6 {strides = array<i32>} : memref<8x128xf32, #tpu.memory_space<vmem>>, vector<8x128xf32>,
    return
  }
  func.func @transform_0(%arg0: i32) -> (i32, i32) {
    %c0_i32 = arith.constant 0 : i32
    %c0_i32_0 = arith.constant 0 : i32
    return %arg0, %c0_i32 : i32, i32
  }
  func.func @transform_1(%arg0: i32) -> (i32, i32) {
    %c0_i32 = arith.constant 0 : i32
    %c0_i32_0 = arith.constant 0 : i32
    %c0_i32_1 = arith.constant 0 : i32
    return %c0_i32, %c0_i32_0 : i32, i32
  }
  func.func @transform_2(%arg0: i32) -> (i32, i32) {
    %c0_i32 = arith.constant 0 : i32
    %c0_i32_0 = arith.constant 0 : i32
    %c0_i32_1 = arith.constant 0 : i32
    return %c0_i32, %c0_i32_0 : i32, i32
  }
  func.func @transform_3(%arg0: i32) -> (i32, i32) {
    %c0_i32 = arith.constant 0 : i32
    %c0_i32_0 = arith.constant 0 : i32
    return %arg0, %c0_i32 : i32, i32
  }
}

</mosaic_0001>

<bundles_post_ra>
// kernel: _head_forward.1
= control target key start
LH: loop header
LB: loop body
LE: loop exit
PB: predicated region body
PF: predicated region fallthrough
CT: control target
= control target key end

     0   :  { %8 = vsyncpa [#allocation3], 0  ;;  %s265_s0 = inlined_call_operand.vmem [shape: f32[8,128], index: 0, kind: input, shape index: {}]   ;;  %s266_s1 = inlined_call_operand.hbm [shape: bf16[128,128], index: 1, kind: input, shape index: {}]   ;;  %s267_s2 = inlined_call_operand.vmem [shape: f32[1,128], index: 2, kind: input, shape index: {}]   ;;  %s268_s3 = inlined_call_operand.hbm [shape: f32[8,128], index: 3, kind: output, shape index: {}]  }
   0x1   :  { %9 = vsyncpa [#allocation4], 0  ;;  %s16_s14 = sshll.u32 %s266_s1, 4  ;;  %s229_s15 = smov [#allocation2]   ;;  %s17_s14 = int_to_ptr.hbm [resolvable:$true] %s16_s14 }
   0x2   :  { %s18_s16 = sshll.u32 %s229_s15, 4  ;;  %s230_s17 = smov 64   ;;  %s19_s16 = int_to_ptr.vmem [resolvable:$true] %s18_s16 }
   0x3   :  { %s231_s18 = smov 4  }
   0x4   :  { %24 = dma.hbm_to_vmem [thread:$0]  %s17_s14, 1024, %s19_s16, [#allocation3], %s230_s17, %s230_s17, %s231_s18  }
   0x5   :  { %225 = dma.done.wait [#allocation3], 1024  }
   0x6   :  { %226 = vsyncadd [#allocation3], 4294966272  ;;  %v171_v0 = vld [vmem:[#allocation2 + $0x38] sm:$0xff]  ;;  %v170_v1 = vld [vmem:[#allocation2 + $0x30] sm:$0xff]  ;;  %s232_s22 = smov [#allocation5]   ;;  %s122_s26 = sshll.u32 %s268_s3, 4  ;;  %s123_s26 = int_to_ptr.hbm [resolvable:$true] %s122_s26 }
   0x7   :  { %101 = vmatpush.bf16.msra.mxu0 %v171_v0  ;;  %v169_v2 = vld [vmem:[#allocation2 + $0x28] sm:$0xff]  ;;  %v168_v3 = vld [vmem:[#allocation2 + $0x20] sm:$0xff]  ;;  %v167_v4 = vld [vmem:[#allocation2 + $0x18] sm:$0xff]  ;;  %s120_s23 = sshll.u32 %s232_s22, 4  ;;  %s121_s23 = int_to_ptr.vmem [resolvable:$true] %s120_s23 }
   0x8   :  { %v166_v5 = vld [vmem:[#allocation2 + $0x10] sm:$0xff]  ;;  %v165_v6 = vld [vmem:[#allocation2 + $0x8] sm:$0xff]  ;;  %v164_v7 = vld [vmem:[#allocation2] sm:$0xff] }
   0x9   :  { %v31_v8 = vld [vmem:[%s265_s0] sm:$0xff] }
   0xa   :  { %v32_v9 = vpack.c.bf16 %v31_v8, %v31_v8  ;;  %v176_v10 = vld [vmem:[%s267_s2] ss:$0 sm:$0xff] }
   0xb   :  { %102 = vmatpush.bf16.msra.mxu0 %v170_v1 }
   0xf   :  { %103 = vmatpush.bf16.msra.mxu0 %v169_v2 }
  0x13   :  { %104 = vmatpush.bf16.msra.mxu0 %v168_v3 }
  0x17   :  { %105 = vmatpush.bf16.msra.mxu0 %v167_v4 }
  0x1b   :  { %106 = vmatpush.bf16.msra.mxu0 %v166_v5 }
  0x1f   :  { %107 = vmatpush.bf16.msra.mxu0 %v165_v6 }
  0x23   :  { %108 = vmatpush.bf16.msra.mxu0 %v164_v7 }
  0x26   :  { %109 = vmatmul.bf16.vlgmr.msra.gmra.mxu0 %v32_v9 }
  0xa3   :  { %v110_v11 = vpop.f32.mrf.mxu0 }
  0xa4   :  { %v111_v12 = vadd.f32 %v176_v10, %v110_v11 }
  0xa6   :  { %114 = vst [vmem:[#allocation5] sm:$0xff] %v111_v12 }
  0xa7   :  { %125 = dma.vmem_to_hbm [thread:$0]  %s121_s23, 128, %s123_s26, [#allocation4]  }
  0xab   :  { %v112_v13 = vpop.f32.mrf.mxu0 }
  0xac   :  { %227 = dma.done.wait [#allocation4], 128  }
  0xad   :  { %228 = vsyncadd [#allocation4], 4294967168 }
  0xae   :  { %130 = vsyncpa [#allocation3], 1 }
  0xaf   :  { %131 = vsyncpa [#allocation4], 1 }

</bundles_post_ra>
